<compile_context>
chip_gen: v5e
topology: v5e:2x2
jax: 0.10.0
libtpu: 0.0.40
codegen_flags: <defaults>
</compile_context>

<pallas_src>
import jax
import jax.numpy as jnp
from jax.experimental import pallas as pl
from jax.experimental.pallas import tpu as pltpu

# Model dims (feature_size is undefined in the original file; pick a small one)
FEATURE_SIZE = 16
SHARED = 64
TOWER_H1 = 32
TOWER_H2 = 16
OUT = 1
N_TOWERS = 9

_SUBLANE = 16  # batch-tile multiple valid for both f32 (8,128) and bf16 (16,128) tiling


def mtl_kernel(x_ref, ws_ref, bs_ref,
               w1_ref, b1_ref, w2_ref, b2_ref, w3_ref, b3_ref,
               out_ref):
    cdt = ws_ref.dtype                      # compute dtype (bf16 by default)
    x = x_ref[...].astype(cdt)              # cast right after DMA (no wrapper pass)

    # Shared layer: Linear(F, 64) + ReLU   (Dropout == identity in eval)
    h = jnp.dot(x, ws_ref[...], preferred_element_type=jnp.float32)
    h = jnp.maximum(h.astype(cdt) + bs_ref[...], 0)                 # (TB, 64)

    # All 9 towers, layer 1 (column-concatenated weights): (TB, 288)
    h1 = jnp.dot(h, w1_ref[...], preferred_element_type=jnp.float32)
    h1 = jnp.maximum(h1.astype(cdt) + b1_ref[...], 0)

    # All 9 towers, layer 2 (block-diagonal weights): (TB, 144)
    h2 = jnp.dot(h1, w2_ref[...], preferred_element_type=jnp.float32)
    h2 = jnp.maximum(h2.astype(cdt) + b2_ref[...], 0)

    # All 9 towers, output layer (block-diagonal): (TB, 9), single store (f32).
    o = jnp.dot(h2, w3_ref[...], preferred_element_type=jnp.float32)
    out_ref[...] = (o + b3_ref[...]).astype(out_ref.dtype)


def _choose_batch_tile(B, block_b):
    tb = min(B, block_b)
    # Guarantee >= 2 grid steps when the batch allows it so the "parallel"
    # axis shards across v7x's two TensorCores (no cost on v5e/v6e).
    if B >= 2 * _SUBLANE:
        tb = min(tb, pl.cdiv(B, 2))
    if tb < B:
        tb = max(_SUBLANE, tb - tb % _SUBLANE)
    return tb


def mtlnet_forward(x, packed, *, block_b=4096):
    """x: (B, FEATURE_SIZE), f32 or bf16.  Returns a lane-dense (B, N_TOWERS)
    f32 array (column t == tower t's (B, 1) output, squeezed).

    block_b: batch tile upper bound. 4096 fits v7x's 64 MiB VMEM comfortably;
    v5e/v6e (128 MiB VMEM) may raise it to 8192 for very large batches."""
    ws, bs, w1c, b1c, w2b, b2c, w3b, b3c = packed
    B, F = x.shape

    tb = _choose_batch_tile(B, block_b)
    grid = (pl.cdiv(B, tb),)
    # NOTE: if B % tb != 0 the padded rows of the last block run garbage
    # compute; safe here (no cross-row reduction, the partial output store is
    # masked by Pallas).

    # Weights/biases: full-array blocks with constant index maps -> they stay
    # VMEM-resident across all grid steps.
    def resident(a):
        return pl.BlockSpec(a.shape, lambda i: (0,) * a.ndim)

    out = pl.pallas_call(
        mtl_kernel,
        out_shape=jax.ShapeDtypeStruct((B, N_TOWERS), jnp.float32),
        grid=grid,
        in_specs=[
            pl.BlockSpec((tb, F), lambda i: (i, 0)),
            resident(ws), resident(bs),
            resident(w1c), resident(b1c),
            resident(w2b), resident(b2c),
            resident(w3b), resident(b3c),
        ],
        out_specs=pl.BlockSpec((tb, N_TOWERS), lambda i: (i, 0)),
        compiler_params=pltpu.CompilerParams(
            dimension_semantics=("parallel",),
            vmem_limit_bytes=48 * 1024 * 1024),
    )(x, ws, bs, w1c, b1c, w2b, b2c, w3b, b3c)
    return out


def mtlnet_forward_tuple(x, packed, **kw):
    """Matches the PyTorch module's return type: tuple of 9 (B, 1) arrays.
    Prefer consuming the (B, 9) slab from mtlnet_forward directly downstream
    (the split is 9 strided HBM copies in XLA)."""
    out = mtlnet_forward(x, packed, **kw)
    return tuple(jnp.split(out, N_TOWERS, axis=1))


def pack_params(params, compute_dtype=jnp.bfloat16):
    """Fuse per-tower weights into concatenated / block-diagonal matrices and
    cast them ONCE to the compute dtype.  MXU accumulation stays f32 in the
    kernel; the final bias (and output) stay f32."""
    ws, bs, w1, b1, w2, b2, w3, b3 = params
    cdt = compute_dtype
    w1_cat = jnp.concatenate(list(w1), axis=1)            # (64, 9*32) = (64, 288)
    b1_cat = b1.reshape(1, N_TOWERS * TOWER_H1)            # (1, 288)
    w2_blk = jax.scipy.linalg.block_diag(*list(w2))        # (288, 144)
    b2_cat = b2.reshape(1, N_TOWERS * TOWER_H2)            # (1, 144)
    w3_blk = jax.scipy.linalg.block_diag(*list(w3))        # (144, 9)
    b3_cat = b3.reshape(1, N_TOWERS * OUT)                 # (1, 9)
    return (ws.astype(cdt), bs.astype(cdt),
            w1_cat.astype(cdt), b1_cat.astype(cdt),
            w2_blk.astype(cdt), b2_cat.astype(cdt),
            w3_blk.astype(cdt), b3_cat.astype(jnp.float32))


def init_params(key):
    """Deterministic init mimicking nn.Linear's U(-1/sqrt(fan_in), +1/sqrt(fan_in))."""
    def linear(key, fan_in, fan_out):
        kw, kb = jax.random.split(key)
        bound = 1.0 / jnp.sqrt(fan_in)
        w = jax.random.uniform(kw, (fan_in, fan_out), jnp.float32, -bound, bound)
        b = jax.random.uniform(kb, (fan_out,), jnp.float32, -bound, bound)
        return w, b

    keys = jax.random.split(key, 1 + 3 * N_TOWERS)
    ws, bs = linear(keys[0], FEATURE_SIZE, SHARED)
    bs = bs.reshape(1, SHARED)

    w1s, b1s, w2s, b2s, w3s, b3s = [], [], [], [], [], []
    for t in range(N_TOWERS):
        w1, b1 = linear(keys[1 + 3 * t + 0], SHARED, TOWER_H1)
        w2, b2 = linear(keys[1 + 3 * t + 1], TOWER_H1, TOWER_H2)
        w3, b3 = linear(keys[1 + 3 * t + 2], TOWER_H2, OUT)
        w1s.append(w1); b1s.append(b1.reshape(1, TOWER_H1))
        w2s.append(w2); b2s.append(b2.reshape(1, TOWER_H2))
        w3s.append(w3); b3s.append(b3.reshape(1, OUT))

    return (ws, bs,
            jnp.stack(w1s), jnp.stack(b1s),
            jnp.stack(w2s), jnp.stack(b2s),
            jnp.stack(w3s), jnp.stack(b3s))


def reference_forward(x, params):
    """Pure-JAX, per-tower reference with identical semantics (dropout = identity)."""
    ws, bs, w1, b1, w2, b2, w3, b3 = params
    h = jnp.maximum(x @ ws + bs, 0.0)
    outs = []
    for t in range(N_TOWERS):
        h1 = jnp.maximum(h @ w1[t] + b1[t], 0.0)
        h2 = jnp.maximum(h1 @ w2[t] + b2[t], 0.0)
        outs.append(h2 @ w3[t] + b3[t])
    return tuple(outs)


if __name__ == "__main__":
    key = jax.random.PRNGKey(0)
    k_param, k_x = jax.random.split(key)

    B = 8
    x = jax.random.normal(k_x, (B, FEATURE_SIZE), jnp.float32)
    params = init_params(k_param)

    # f32 compute path — tight check vs the per-tower reference; PyTorch-style
    # 9-tuple return.
    packed_f32 = pack_params(params, compute_dtype=jnp.float32)
    outs = jax.block_until_ready(mtlnet_forward_tuple(x, packed_f32))
    refs = reference_forward(x, params)
    for o, r in zip(outs, refs):
        assert o.shape == (B, OUT)
        assert jnp.allclose(o, r, atol=1e-4, rtol=1e-4)

    # Multi-tile batch grid (>= 2 "parallel" steps; exercises pipelining and
    # the partial-grid machinery), still f32 / tight tolerance.
    B2 = 64
    x2 = jax.random.normal(jax.random.PRNGKey(1), (B2, FEATURE_SIZE), jnp.float32)
    out2 = jax.block_until_ready(mtlnet_forward(x2, packed_f32, block_b=16))
    ref2 = jnp.concatenate(reference_forward(x2, params), axis=1)
    assert out2.shape == (B2, N_TOWERS)
    assert jnp.allclose(out2, ref2, atol=1e-4, rtol=1e-4)

    # Default bf16 compute path (f32 MXU accumulation) — loose tolerance.
    # Note: bf16 compute only matches the f32 reference to ~1e-2 relative;
    # precision-sensitive callers should pack with compute_dtype=jnp.float32.
    packed_bf16 = pack_params(params)                      # bf16 by default
    out_bf = jax.block_until_ready(mtlnet_forward(x2, packed_bf16, block_b=16))
    assert jnp.allclose(out_bf, ref2, atol=1e-1, rtol=1e-1)

    # bf16 activations too (halves x HBM bytes; in-kernel cast becomes a no-op).
    out_bf2 = jax.block_until_ready(
        mtlnet_forward(x2.astype(jnp.bfloat16), packed_bf16, block_b=16))
    assert jnp.allclose(out_bf2, ref2, atol=1e-1, rtol=1e-1)

    print("KERNEL_OK")
</pallas_src>

<mosaic_0001>
module attributes {stable_mosaic.version = 11 : i64} {
  func.func @mtl_kernel(%arg0: i32, %arg1: memref<8x16xf32, #tpu.memory_space<vmem>>, %arg2: memref<16x64xf32, #tpu.memory_space<vmem>>, %arg3: memref<1x64xf32, #tpu.memory_space<vmem>>, %arg4: memref<64x288xf32, #tpu.memory_space<vmem>>, %arg5: memref<1x288xf32, #tpu.memory_space<vmem>>, %arg6: memref<288x144xf32, #tpu.memory_space<vmem>>, %arg7: memref<1x144xf32, #tpu.memory_space<vmem>>, %arg8: memref<144x9xf32, #tpu.memory_space<vmem>>, %arg9: memref<1x9xf32, #tpu.memory_space<vmem>>, %arg10: memref<8x9xf32, #tpu.memory_space<vmem>>) attributes {dimension_semantics = [#tpu.dimension_semantics<parallel>], iteration_bounds = array<i64: 1>, scalar_prefetch = 0 : i64, scratch_operands = 0 : i64, tpu.core_type = #tpu.core_type<tc>, window_params = [{transform_indices = @transform_0, window_bounds = array<i64: 8, 16>}, {pipeline_mode = #tpu.pipeline_mode<synchronous>, transform_indices = @transform_1, window_bounds = array<i64: 16, 64>}, {pipeline_mode = #tpu.pipeline_mode<synchronous>, transform_indices = @transform_2, window_bounds = array<i64: 1, 64>}, {pipeline_mode = #tpu.pipeline_mode<synchronous>, transform_indices = @transform_3, window_bounds = array<i64: 64, 288>}, {pipeline_mode = #tpu.pipeline_mode<synchronous>, transform_indices = @transform_4, window_bounds = array<i64: 1, 288>}, {pipeline_mode = #tpu.pipeline_mode<synchronous>, transform_indices = @transform_5, window_bounds = array<i64: 288, 144>}, {pipeline_mode = #tpu.pipeline_mode<synchronous>, transform_indices = @transform_6, window_bounds = array<i64: 1, 144>}, {pipeline_mode = #tpu.pipeline_mode<synchronous>, transform_indices = @transform_7, window_bounds = array<i64: 144, 9>}, {pipeline_mode = #tpu.pipeline_mode<synchronous>, transform_indices = @transform_8, window_bounds = array<i64: 1, 9>}, {transform_indices = @transform_9, window_bounds = array<i64: 8, 9>}]} {
    %c0 = arith.constant 0 : index
    %c0_0 = arith.constant 0 : index
    %0 = vector.load %arg1[%c0, %c0_0] : memref<8x16xf32, #tpu.memory_space<vmem>>, vector<8x16xf32>
    %c0_1 = arith.constant 0 : index
    %c0_2 = arith.constant 0 : index
    %1 = vector.load %arg2[%c0_1, %c0_2] : memref<16x64xf32, #tpu.memory_space<vmem>>, vector<16x64xf32>
    %cst = arith.constant dense<0.000000e+00> : vector<8x64xf32>
    %2 = tpu.matmul %0, %1, %cst {dimension_numbers = #tpu.dot_dimension_numbers<[1], [0], [0], [1], [0, 0, 1, 1], [], []>} : vector<8x16xf32>, vector<16x64xf32>, vector<8x64xf32> -> vector<8x64xf32>
    %c0_3 = arith.constant 0 : index
    %c0_4 = arith.constant 0 : index
    %3 = vector.load %arg3[%c0_3, %c0_4] : memref<1x64xf32, #tpu.memory_space<vmem>>, vector<1x64xf32>
    %4 = vector.broadcast %3 : vector<1x64xf32> to vector<8x64xf32>
    %5 = arith.addf %2, %4 : vector<8x64xf32>
    %cst_5 = arith.constant 0.000000e+00 : f32
    %6 = vector.broadcast %cst_5 : f32 to vector<8x64xf32>
    %7 = arith.maximumf %5, %6 : vector<8x64xf32>
    %c0_6 = arith.constant 0 : index
    %c0_7 = arith.constant 0 : index
    %8 = vector.load %arg4[%c0_6, %c0_7] : memref<64x288xf32, #tpu.memory_space<vmem>>, vector<64x288xf32>
    %cst_8 = arith.constant dense<0.000000e+00> : vector<8x288xf32>
    %9 = tpu.matmul %7, %8, %cst_8 {dimension_numbers = #tpu.dot_dimension_numbers<[1], [0], [0], [1], [0, 0, 1, 1], [], []>} : vector<8x64xf32>, vector<64x288xf32>, vector<8x288xf32> -> vector<8x288xf32>
    %c0_9 = arith.constant 0 : index
    %c0_10 = arith.constant 0 : index
    %10 = vector.load %arg5[%c0_9, %c0_10] : memref<1x288xf32, #tpu.memory_space<vmem>>, vector<1x288xf32>
    %11 = vector.broadcast %10 : vector<1x288xf32> to vector<8x288xf32>
    %12 = arith.addf %9, %11 : vector<8x288xf32>
    %cst_11 = arith.constant 0.000000e+00 : f32
    %13 = vector.broadcast %cst_11 : f32 to vector<8x288xf32>
    %14 = arith.maximumf %12, %13 : vector<8x288xf32>
    %c0_12 = arith.constant 0 : index
    %c0_13 = arith.constant 0 : index
    %15 = vector.load %arg6[%c0_12, %c0_13] : memref<288x144xf32, #tpu.memory_space<vmem>>, vector<288x144xf32>
    %cst_14 = arith.constant dense<0.000000e+00> : vector<8x144xf32>
    %16 = tpu.matmul %14, %15, %cst_14 {dimension_numbers = #tpu.dot_dimension_numbers<[1], [0], [0], [1], [0, 0, 1, 1], [], []>} : vector<8x288xf32>, vector<288x144xf32>, vector<8x144xf32> -> vector<8x144xf32>
    %c0_15 = arith.constant 0 : index
    %c0_16 = arith.constant 0 : index
    %17 = vector.load %arg7[%c0_15, %c0_16] : memref<1x144xf32, #tpu.memory_space<vmem>>, vector<1x144xf32>
    %18 = vector.broadcast %17 : vector<1x144xf32> to vector<8x144xf32>
    %19 = arith.addf %16, %18 : vector<8x144xf32>
    %cst_17 = arith.constant 0.000000e+00 : f32
    %20 = vector.broadcast %cst_17 : f32 to vector<8x144xf32>
    %21 = arith.maximumf %19, %20 : vector<8x144xf32>
    %c0_18 = arith.constant 0 : index
    %c0_19 = arith.constant 0 : index
    %22 = vector.load %arg8[%c0_18, %c0_19] : memref<144x9xf32, #tpu.memory_space<vmem>>, vector<144x9xf32>
    %cst_20 = arith.constant dense<0.000000e+00> : vector<8x9xf32>
    %23 = tpu.matmul %21, %22, %cst_20 {dimension_numbers = #tpu.dot_dimension_numbers<[1], [0], [0], [1], [0, 0, 1, 1], [], []>} : vector<8x144xf32>, vector<144x9xf32>, vector<8x9xf32> -> vector<8x9xf32>
    %c0_21 = arith.constant 0 : index
    %c0_22 = arith.constant 0 : index
    %24 = vector.load %arg9[%c0_21, %c0_22] : memref<1x9xf32, #tpu.memory_space<vmem>>, vector<1x9xf32>
    %25 = vector.broadcast %24 : vector<1x9xf32> to vector<8x9xf32>
    %26 = arith.addf %23, %25 : vector<8x9xf32>
    %c0_23 = arith.constant 0 : index
    %c0_24 = arith.constant 0 : index
    %27 = vector.load %arg10[%c0_23, %c0_24] : memref<8x9xf32, #tpu.memory_space<vmem>>, vector<8x9xf32>
    tpu.vector_store %arg10[%c0_23, %c0_24], %26 {strides = array<i32>} : memref<8x9xf32, #tpu.memory_space<vmem>>, vector<8x9xf32>,
    return
  }
  func.func @transform_0(%arg0: i32) -> (i32, i32) {
    %c0_i32 = arith.constant 0 : i32
    %c0_i32_0 = arith.constant 0 : i32
    return %arg0, %c0_i32 : i32, i32
  }
  func.func @transform_1(%arg0: i32) -> (i32, i32) {
    %c0_i32 = arith.constant 0 : i32
    %c0_i32_0 = arith.constant 0 : i32
    %c0_i32_1 = arith.constant 0 : i32
    return %c0_i32, %c0_i32_0 : i32, i32
  }
  func.func @transform_2(%arg0: i32) -> (i32, i32) {
    %c0_i32 = arith.constant 0 : i32
    %c0_i32_0 = arith.constant 0 : i32
    %c0_i32_1 = arith.constant 0 : i32
    return %c0_i32, %c0_i32_0 : i32, i32
  }
  func.func @transform_3(%arg0: i32) -> (i32, i32) {
    %c0_i32 = arith.constant 0 : i32
    %c0_i32_0 = arith.constant 0 : i32
    %c0_i32_1 = arith.constant 0 : i32
    return %c0_i32, %c0_i32_0 : i32, i32
  }
  func.func @transform_4(%arg0: i32) -> (i32, i32) {
    %c0_i32 = arith.constant 0 : i32
    %c0_i32_0 = arith.constant 0 : i32
    %c0_i32_1 = arith.constant 0 : i32
    return %c0_i32, %c0_i32_0 : i32, i32
  }
  func.func @transform_5(%arg0: i32) -> (i32, i32) {
    %c0_i32 = arith.constant 0 : i32
    %c0_i32_0 = arith.constant 0 : i32
    %c0_i32_1 = arith.constant 0 : i32
    return %c0_i32, %c0_i32_0 : i32, i32
  }
  func.func @transform_6(%arg0: i32) -> (i32, i32) {
    %c0_i32 = arith.constant 0 : i32
    %c0_i32_0 = arith.constant 0 : i32
    %c0_i32_1 = arith.constant 0 : i32
    return %c0_i32, %c0_i32_0 : i32, i32
  }
  func.func @transform_7(%arg0: i32) -> (i32, i32) {
    %c0_i32 = arith.constant 0 : i32
    %c0_i32_0 = arith.constant 0 : i32
    %c0_i32_1 = arith.constant 0 : i32
    return %c0_i32, %c0_i32_0 : i32, i32
  }
  func.func @transform_8(%arg0: i32) -> (i32, i32) {
    %c0_i32 = arith.constant 0 : i32
    %c0_i32_0 = arith.constant 0 : i32
    %c0_i32_1 = arith.constant 0 : i32
    return %c0_i32, %c0_i32_0 : i32, i32
  }
  func.func @transform_9(%arg0: i32) -> (i32, i32) {
    %c0_i32 = arith.constant 0 : i32
    %c0_i32_0 = arith.constant 0 : i32
    return %arg0, %c0_i32 : i32, i32
  }
}

</mosaic_0001>

<bundles_post_ra>
// kernel: tpu_custom_call.1
= control target key start
LH: loop header
LB: loop body
LE: loop exit
PB: predicated region body
PF: predicated region fallthrough
CT: control target
= control target key end

     0   :  { %vm40_vm0 = vcmask 130048   ;;  %s906_s0 = inlined_call_operand.vmem [shape: f32[8,16], index: 0, kind: input, shape index: {}]   ;;  %s907_s1 = inlined_call_operand.vmem [shape: f32[16,64], index: 1, kind: input, shape index: {}]   ;;  %s908_s2 = inlined_call_operand.vmem [shape: f32[1,64], index: 2, kind: input, shape index: {}]   ;;  %s909_s3 = inlined_call_operand.vmem [shape: f32[64,288], index: 3, kind: input, shape index: {}]   ;;  %s910_s4 = inlined_call_operand.vmem [shape: f32[1,288], index: 4, kind: input, shape index: {}]   ;;  %s911_s5 = inlined_call_operand.vmem [shape: f32[288,144], index: 5, kind: input, shape index: {}]   ;;  %s912_s6 = inlined_call_operand.vmem [shape: f32[1,144], index: 6, kind: input, shape index: {}]   ;;  %s913_s7 = inlined_call_operand.vmem [shape: f32[144,9], index: 7, kind: input, shape index: {}]   ;;  %s914_s8 = inlined_call_operand.vmem [shape: f32[1,9], index: 8, kind: input, shape index: {}]   ;;  %s915_s9 = inlined_call_operand.hbm [shape: f32[8,9], index: 9, kind: output, shape index: {}]  }
   0x1   :  { %v35_v0 = vld [vmem:[%s907_s1 + $0x8] sm:$0xff]  ;;  %v34_v1 = vld [vmem:[%s907_s1] sm:$0xff]  ;;  %v87_v3 = vld [vmem:[%s909_s3 + $0xb0] sm:$0xff] }
   0x2   :  { %58 = vmatpush.msra.mxu1 %v35_v0  ;;  %v33_v2 = vld [vmem:[%s906_s0] sm:$0xff]  ;;  %v88_v4 = vld [vmem:[%s909_s3 + $0xb8] sm:$0xff]  ;;  %v86_v5 = vld [vmem:[%s909_s3 + $0xa8] sm:$0xff]  ;;  %129 = vmatpush.msra.mxu2 %v87_v3 }
   0x3   :  { %149 = vmatpush.msra.mxu3 %v88_v4  ;;  %v84_v6 = vld [vmem:[%s909_s3 + $0x98] sm:$0xff]  ;;  %v85_v7 = vld [vmem:[%s909_s3 + $0xa0] sm:$0xff]  ;;  %v83_v9 = vld [vmem:[%s909_s3 + $0x90] sm:$0xff] }
   0x4   :  { %59 = vmatpush.msra.mxu1 %v34_v1  ;;  %v81_v8 = vld [vmem:[%s909_s3 + $0x80] sm:$0xff]  ;;  %130 = vmatpush.msra.mxu2 %v84_v6  ;;  %v82_v10 = vld [vmem:[%s909_s3 + $0x88] sm:$0xff]  ;;  %v80_v11 = vld [vmem:[%s909_s3 + $0x78] sm:$0xff] }
   0x5   :  { %451 = vmatmul.msk.f32.vlgmr.msra.gmra.mxu1 %vm40_vm0, %v33_v2  ;;  %150 = vmatpush.msra.mxu3 %v85_v7  ;;  %v78_v12 = vld [vmem:[%s909_s3 + $0x68] sm:$0xff]  ;;  %v79_v13 = vld [vmem:[%s909_s3 + $0x70] sm:$0xff] }
   0x6   :  { %109 = vmatpush.msrb.mxu1 %v86_v5  ;;  %131 = vmatpush.msra.mxu2 %v81_v8  ;;  %v75_v14 = vld [vmem:[%s909_s3 + $0x50] sm:$0xff] }
   0x7   :  { %151 = vmatpush.msra.mxu3 %v82_v10 }
   0x8   :  { %110 = vmatpush.msrb.mxu1 %v83_v9 }
   0x9   :  { %14 = vsyncpa [#allocation3], 0  ;;  %v77_v15 = vld [vmem:[%s909_s3 + $0x60] sm:$0xff]  ;;  %132 = vmatpush.msra.mxu2 %v78_v12  ;;  %v76_v16 = vld [vmem:[%s909_s3 + $0x58] sm:$0xff]  ;;  %152 = vmatpush.msra.mxu3 %v79_v13  ;;  %vm97_vm1 = vcmask 523264   ;;  %vm242_vm2 = vcmask 261120  }
   0xa   :  { %111 = vmatpush.msrb.mxu1 %v80_v11  ;;  %v74_v17 = vld [vmem:[%s909_s3 + $0x48] sm:$0xff]  ;;  %v71_v18 = vld [vmem:[%s909_s3 + $0x30] sm:$0xff]  ;;  %v72_v19 = vld [vmem:[%s909_s3 + $0x38] sm:$0xff]  ;;  %s487_s25 = smov [#allocation2]   ;;  %vm433_vm3 = vcmask 72704  }
   0xb   :  { %133 = vmatpush.msra.mxu2 %v75_v14  ;;  %153 = vmatpush.msra.mxu3 %v76_v16  ;;  %v73_v20 = vld [vmem:[%s909_s3 + $0x40] sm:$0xff]  ;;  %v68_v21 = vld [vmem:[%s909_s3 + $0x18] sm:$0xff]  ;;  %v70_v23 = vld [vmem:[%s909_s3 + $0x28] sm:$0xff]  ;;  %s440_s26 = sshll.u32 %s487_s25, 4  ;;  %s441_s26 = int_to_ptr.vmem [resolvable:$true] %s440_s26 }
   0xc   :  { %112 = vmatpush.msrb.mxu1 %v77_v15  ;;  %v69_v22 = vld [vmem:[%s909_s3 + $0x20] sm:$0xff]  ;;  %v66_v25 = vld [vmem:[%s909_s3 + $0x8] sm:$0xff]  ;;  %v67_v26 = vld [vmem:[%s909_s3 + $0x10] sm:$0xff] }
   0xd   :  { %134 = vmatpush.msra.mxu2 %v72_v19  ;;  %154 = vmatpush.msra.mxu3 %v73_v20  ;;  %v65_v24 = vld [vmem:[%s909_s3] sm:$0xff]  ;;  %v194_v27 = vld [vmem:[%s911_s5 + $0xf0] sm:$0xff]  ;;  %v195_v28 = vld [vmem:[%s911_s5 + $0xf8] sm:$0xff] }
   0xe   :  { %113 = vmatpush.msrb.mxu1 %v74_v17  ;;  %v192_v29 = vld [vmem:[%s911_s5 + $0xe0] sm:$0xff]  ;;  %246 = vmatpush.msra.mxu0 %v194_v27  ;;  %v193_v30 = vld [vmem:[%s911_s5 + $0xe8] sm:$0xff]  ;;  %v190_v31 = vld [vmem:[%s911_s5 + $0xd0] sm:$0xff] }
   0xf   :  { %135 = vmatpush.msra.mxu2 %v69_v22  ;;  %155 = vmatpush.msra.mxu3 %v70_v23  ;;  %v191_v32 = vld [vmem:[%s911_s5 + $0xd8] sm:$0xff]  ;;  %v226_v33 = vld [vmem:[%s911_s5 + $0x1f0] sm:$0xff]  ;;  %v224_v35 = vld [vmem:[%s911_s5 + $0x1e0] sm:$0xff] }
  0x10   :  { %114 = vmatpush.msrb.mxu1 %v71_v18  ;;  %247 = vmatpush.msra.mxu0 %v192_v29  ;;  %v234_v34 = vld [vmem:[%s911_s5 + $0x230] sm:$0xff]  ;;  %v188_v36 = vld [vmem:[%s911_s5 + $0xc0] sm:$0xff]  ;;  %v189_v37 = vld [vmem:[%s911_s5 + $0xc8] sm:$0xff] }
  0x11   :  { %136 = vmatpush.msra.mxu2 %v66_v25  ;;  %156 = vmatpush.msra.mxu3 %v67_v26  ;;  %v232_v38 = vld [vmem:[%s911_s5 + $0x220] sm:$0xff]  ;;  %v222_v39 = vld [vmem:[%s911_s5 + $0x1d0] sm:$0xff]  ;;  %v187_v42 = vld [vmem:[%s911_s5 + $0xb8] sm:$0xff] }
  0x12   :  { %115 = vmatpush.msrb.mxu1 %v68_v21  ;;  %248 = vmatpush.msra.mxu0 %v190_v31  ;;  %v230_v40 = vld [vmem:[%s911_s5 + $0x210] sm:$0xff]  ;;  %v220_v43 = vld [vmem:[%s911_s5 + $0x1c0] sm:$0xff]  ;;  %v185_v46 = vld [vmem:[%s911_s5 + $0xa8] sm:$0xff] }
  0x13   :  { %306 = vmatpush.msrb.mxu3 %v195_v28  ;;  %298 = vmatpush.msrb.mxu2 %v234_v34  ;;  %v186_v41 = vld [vmem:[%s911_s5 + $0xb0] sm:$0xff]  ;;  %v228_v44 = vld [vmem:[%s911_s5 + $0x200] sm:$0xff]  ;;  %v183_v49 = vld [vmem:[%s911_s5 + $0x98] sm:$0xff] }
  0x14   :  { %116 = vmatpush.msrb.mxu1 %v65_v24  ;;  %249 = vmatpush.msra.mxu0 %v188_v36  ;;  %v184_v45 = vld [vmem:[%s911_s5 + $0xa0] sm:$0xff]  ;;  %v218_v47 = vld [vmem:[%s911_s5 + $0x1b0] sm:$0xff]  ;;  %v181_v52 = vld [vmem:[%s911_s5 + $0x88] sm:$0xff] }
  0x15   :  { %307 = vmatpush.msrb.mxu3 %v193_v30  ;;  %299 = vmatpush.msrb.mxu2 %v232_v38  ;;  %v182_v48 = vld [vmem:[%s911_s5 + $0x90] sm:$0xff]  ;;  %v216_v50 = vld [vmem:[%s911_s5 + $0x1a0] sm:$0xff]  ;;  %v179_v55 = vld [vmem:[%s911_s5 + $0x78] sm:$0xff] }
  0x16   :  { %266 = vmatpush.msra.mxu1 %v226_v33  ;;  %250 = vmatpush.msra.mxu0 %v186_v41  ;;  %v180_v51 = vld [vmem:[%s911_s5 + $0x80] sm:$0xff]  ;;  %v214_v53 = vld [vmem:[%s911_s5 + $0x190] sm:$0xff]  ;;  %v177_v58 = vld [vmem:[%s911_s5 + $0x68] sm:$0xff] }
  0x17   :  { %308 = vmatpush.msrb.mxu3 %v191_v32  ;;  %300 = vmatpush.msrb.mxu2 %v230_v40  ;;  %v178_v54 = vld [vmem:[%s911_s5 + $0x70] sm:$0xff]  ;;  %v212_v56 = vld [vmem:[%s911_s5 + $0x180] sm:$0xff]  ;;  %v175_v61 = vld [vmem:[%s911_s5 + $0x58] sm:$0xff] }
  0x18   :  { %267 = vmatpush.msra.mxu1 %v224_v35  ;;  %251 = vmatpush.msra.mxu0 %v184_v45  ;;  %v176_v57 = vld [vmem:[%s911_s5 + $0x60] sm:$0xff]  ;;  %v210_v59 = vld [vmem:[%s911_s5 + $0x170] sm:$0xff]  ;;  %v173_v0 = vld [vmem:[%s911_s5 + $0x48] sm:$0xff] }
  0x19   :  { %309 = vmatpush.msrb.mxu3 %v189_v37  ;;  %301 = vmatpush.msrb.mxu2 %v228_v44  ;;  %v174_v60 = vld [vmem:[%s911_s5 + $0x50] sm:$0xff]  ;;  %v208_v62 = vld [vmem:[%s911_s5 + $0x160] sm:$0xff]  ;;  %v171_v2 = vld [vmem:[%s911_s5 + $0x38] sm:$0xff] }
  0x1a   :  { %268 = vmatpush.msra.mxu1 %v222_v39  ;;  %252 = vmatpush.msra.mxu0 %v182_v48  ;;  %v172_v63 = vld [vmem:[%s911_s5 + $0x40] sm:$0xff]  ;;  %v170_v1 = vld [vmem:[%s911_s5 + $0x30] sm:$0xff]  ;;  %v227_v7 = vld [vmem:[%s911_s5 + $0x1f8] sm:$0xff] }
  0x1b   :  { %310 = vmatpush.msrb.mxu3 %v187_v42  ;;  %v459_v3 = vld [vmem:[%s908_s2] ss:$0 sm:$0xff]  ;;  %v225_v8 = vld [vmem:[%s911_s5 + $0x1e8] sm:$0xff]  ;;  %v223_v9 = vld [vmem:[%s911_s5 + $0x1d8] sm:$0xff]  ;;  %s442_s2 = sshll.u32 %s915_s9, 4  ;;  %s443_s2 = int_to_ptr.hbm [resolvable:$true] %s442_s2 }
  0x1c   :  { %269 = vmatpush.msra.mxu1 %v220_v43  ;;  %253 = vmatpush.msra.mxu0 %v180_v51  ;;  %v221_v10 = vld [vmem:[%s911_s5 + $0x1c8] sm:$0xff]  ;;  %v219_v11 = vld [vmem:[%s911_s5 + $0x1b8] sm:$0xff]  ;;  %v168_v13 = vld [vmem:[%s911_s5 + $0x20] sm:$0xff] }
  0x1d   :  { %311 = vmatpush.msrb.mxu3 %v185_v46  ;;  %v217_v12 = vld [vmem:[%s911_s5 + $0x1a8] sm:$0xff]  ;;  %v206_v14 = vld [vmem:[%s911_s5 + $0x150] sm:$0xff]  ;;  %v215_v16 = vld [vmem:[%s911_s5 + $0x198] sm:$0xff] }
  0x1e   :  { %270 = vmatpush.msra.mxu1 %v218_v47  ;;  %254 = vmatpush.msra.mxu0 %v178_v54  ;;  %v169_v15 = vld [vmem:[%s911_s5 + $0x28] sm:$0xff]  ;;  %v166_v17 = vld [vmem:[%s911_s5 + $0x10] sm:$0xff]  ;;  %v204_v18 = vld [vmem:[%s911_s5 + $0x140] sm:$0xff] }
  0x1f   :  { %312 = vmatpush.msrb.mxu3 %v183_v49  ;;  %v167_v19 = vld [vmem:[%s911_s5 + $0x18] sm:$0xff]  ;;  %v213_v20 = vld [vmem:[%s911_s5 + $0x188] sm:$0xff]  ;;  %v164_v21 = vld [vmem:[%s911_s5] sm:$0xff] }
  0x20   :  { %271 = vmatpush.msra.mxu1 %v216_v50  ;;  %255 = vmatpush.msra.mxu0 %v176_v57  ;;  %v202_v22 = vld [vmem:[%s911_s5 + $0x130] sm:$0xff]  ;;  %v165_v23 = vld [vmem:[%s911_s5 + $0x8] sm:$0xff]  ;;  %v211_v24 = vld [vmem:[%s911_s5 + $0x178] sm:$0xff] }
  0x21   :  { %313 = vmatpush.msrb.mxu3 %v181_v52  ;;  %v200_v25 = vld [vmem:[%s911_s5 + $0x120] sm:$0xff]  ;;  %v209_v26 = vld [vmem:[%s911_s5 + $0x168] sm:$0xff]  ;;  %v235_v27 = vld [vmem:[%s911_s5 + $0x238] sm:$0xff] }
  0x22   :  { %272 = vmatpush.msra.mxu1 %v214_v53  ;;  %256 = vmatpush.msra.mxu0 %v174_v60  ;;  %v198_v28 = vld [vmem:[%s911_s5 + $0x110] sm:$0xff]  ;;  %v207_v29 = vld [vmem:[%s911_s5 + $0x158] sm:$0xff]  ;;  %v233_v30 = vld [vmem:[%s911_s5 + $0x228] sm:$0xff] }
  0x23   :  { %314 = vmatpush.msrb.mxu3 %v179_v55  ;;  %v196_v31 = vld [vmem:[%s911_s5 + $0x100] sm:$0xff]  ;;  %v205_v32 = vld [vmem:[%s911_s5 + $0x148] sm:$0xff]  ;;  %v231_v33 = vld [vmem:[%s911_s5 + $0x218] sm:$0xff] }
  0x24   :  { %273 = vmatpush.msra.mxu1 %v212_v56  ;;  %257 = vmatpush.msra.mxu0 %v172_v63  ;;  %v203_v34 = vld [vmem:[%s911_s5 + $0x138] sm:$0xff]  ;;  %v229_v35 = vld [vmem:[%s911_s5 + $0x208] sm:$0xff]  ;;  %v382_v40 = vld [vmem:[%s913_s7 + $0x70] sm:$0xff] }
  0x25   :  { %315 = vmatpush.msrb.mxu3 %v177_v58  ;;  %v201_v36 = vld [vmem:[%s911_s5 + $0x128] sm:$0xff]  ;;  %v199_v37 = vld [vmem:[%s911_s5 + $0x118] sm:$0xff]  ;;  %v380_v42 = vld [vmem:[%s913_s7 + $0x60] sm:$0xff] }
  0x26   :  { %274 = vmatpush.msra.mxu1 %v210_v59  ;;  %258 = vmatpush.msra.mxu0 %v170_v1  ;;  %v197_v38 = vld [vmem:[%s911_s5 + $0x108] sm:$0xff]  ;;  %v383_v39 = vld [vmem:[%s913_s7 + $0x78] sm:$0xff]  ;;  %v89_v43 = vld [vmem:[%s910_s4] sm:$0x7] }
  0x27   :  { %316 = vmatpush.msrb.mxu3 %v175_v61  ;;  %v381_v41 = vld [vmem:[%s913_s7 + $0x68] sm:$0xff]  ;;  %v379_v44 = vld [vmem:[%s913_s7 + $0x58] sm:$0xff]  ;;  %v378_v45 = vld [vmem:[%s913_s7 + $0x50] sm:$0xff]  ;;  %v91_v46 = vperm.slane %v89_v43, 0  ;;  %v92_v51 = vperm.slane %v89_v43, 1  ;;  %v93_v52 = vperm.slane %v89_v43, 2 }
  0x28   :  { %275 = vmatpush.msra.mxu1 %v208_v62  ;;  %259 = vmatpush.msra.mxu0 %v168_v13  ;;  %v377_v47 = vld [vmem:[%s913_s7 + $0x48] sm:$0xff]  ;;  %v376_v59 = vld [vmem:[%s913_s7 + $0x40] sm:$0xff]  ;;  %v375_v60 = vld [vmem:[%s913_s7 + $0x38] sm:$0xff] }
  0x29   :  { %317 = vmatpush.msrb.mxu3 %v173_v0  ;;  %v374_v61 = vld [vmem:[%s913_s7 + $0x30] sm:$0xff]  ;;  %v373_v62 = vld [vmem:[%s913_s7 + $0x28] sm:$0xff]  ;;  %v372_v63 = vld [vmem:[%s913_s7 + $0x20] sm:$0xff] }
  0x2a   :  { %276 = vmatpush.msra.mxu1 %v206_v14  ;;  %260 = vmatpush.msra.mxu0 %v166_v17  ;;  %v371_v0 = vld [vmem:[%s913_s7 + $0x18] sm:$0xff]  ;;  %v370_v1 = vld [vmem:[%s913_s7 + $0x10] sm:$0xff] }
  0x2b   :  { %318 = vmatpush.msrb.mxu3 %v171_v2  ;;  %v369_v2 = vld [vmem:[%s913_s7 + $0x8] sm:$0xff] }
  0x2c   :  { %277 = vmatpush.msra.mxu1 %v204_v18  ;;  %261 = vmatpush.msra.mxu0 %v164_v21 }
  0x2d   :  { %319 = vmatpush.msrb.mxu3 %v169_v15 }
  0x2e   :  { %278 = vmatpush.msra.mxu1 %v202_v22  ;;  %393 = vmatpush.msrb.mxu0 %v383_v39 }
  0x2f   :  { %320 = vmatpush.msrb.mxu3 %v167_v19 }
  0x30   :  { %279 = vmatpush.msra.mxu1 %v200_v25  ;;  %394 = vmatpush.msrb.mxu0 %v382_v40 }
  0x31   :  { %321 = vmatpush.msrb.mxu3 %v165_v23  ;;  %v460_v23 = vld [vmem:[%s914_s8] ss:$0 sm:$0xff] }
  0x32   :  { %280 = vmatpush.msra.mxu1 %v198_v28  ;;  %395 = vmatpush.msrb.mxu0 %v381_v41 }
  0x34   :  { %281 = vmatpush.msra.mxu1 %v196_v31  ;;  %396 = vmatpush.msrb.mxu0 %v380_v42 }
  0x36   :  { %397 = vmatpush.msrb.mxu0 %v379_v44 }
  0x38   :  { %398 = vmatpush.msrb.mxu0 %v378_v45 }
  0x3a   :  { %399 = vmatpush.msrb.mxu0 %v377_v47 }
  0x3c   :  { %400 = vmatpush.msrb.mxu0 %v376_v59 }
  0x3e   :  { %401 = vmatpush.msrb.mxu0 %v375_v60 }
  0x40   :  { %402 = vmatpush.msrb.mxu0 %v374_v61 }
  0x42   :  { %403 = vmatpush.msrb.mxu0 %v373_v62 }
  0x44   :  { %404 = vmatpush.msrb.mxu0 %v372_v63 }
  0x46   :  { %405 = vmatpush.msrb.mxu0 %v371_v0 }
  0x48   :  { %406 = vmatpush.msrb.mxu0 %v370_v1 }
  0x4a   :  { %407 = vmatpush.msrb.mxu0 %v369_v2 }
  0x82   :  { %v61_v4 = vpop.f32.mrf.mxu1 }
  0x83   :  { %v62_v5 = vadd.f32 %v459_v3, %v61_v4  ;;  %v368_v3 = vld [vmem:[%s913_s7] sm:$0xff]  ;;  %v385_v4 = vld [vmem:[%s913_s7 + $0x88] sm:$0xff] }
  0x84   :  { %408 = vmatpush.msrb.mxu0 %v368_v3 }
  0x85   :  { %v64_v6 = vmax.f32 %v62_v5, 0.0  ;;  %v384_v5 = vld [vmem:[%s913_s7 + $0x80] sm:$0xff] }
  0x87   :  { %452 = vmatmul.msk.f32.vlgmr.msrb.gmra.mxu1 %vm97_vm1, %v64_v6  ;;  %453 = vmatmul.msk.f32.vlgmr.msra.gmra.mxu2 %vm97_vm1, %v64_v6 }
  0x88   :  { %454 = vmatmul.msk.f32.vlgmr.msra.gmra.mxu3 %vm97_vm1, %v64_v6  ;;  %326 = vmatpush.msra.mxu2 %v227_v7  ;;  %v236_v6 = vld [vmem:[%s912_s6] sm:$0x3] }
  0x89   :  { %358 = vmatpush.msra.mxu3 %v235_v27  ;;  %427 = vmatpush.msrb.mxu1 %v385_v4  ;;  %v238_v7 = vperm.slane %v236_v6, 0  ;;  %v239_v15 = vperm.slane %v236_v6, 1 }
  0x8a   :  { %327 = vmatpush.msra.mxu2 %v225_v8 }
  0x8b   :  { %359 = vmatpush.msra.mxu3 %v233_v30  ;;  %428 = vmatpush.msrb.mxu1 %v384_v5 }
  0x8c   :  { %328 = vmatpush.msra.mxu2 %v223_v9 }
  0x8d   :  { %360 = vmatpush.msra.mxu3 %v231_v33 }
  0x8e   :  { %329 = vmatpush.msra.mxu2 %v221_v10 }
  0x8f   :  { %361 = vmatpush.msra.mxu3 %v229_v35 }
  0x90   :  { %330 = vmatpush.msra.mxu2 %v219_v11 }
  0x92   :  { %331 = vmatpush.msra.mxu2 %v217_v12 }
  0x94   :  { %332 = vmatpush.msra.mxu2 %v215_v16 }
  0x96   :  { %333 = vmatpush.msra.mxu2 %v213_v20 }
  0x98   :  { %334 = vmatpush.msra.mxu2 %v211_v24 }
  0x9a   :  { %335 = vmatpush.msra.mxu2 %v209_v26 }
  0x9c   :  { %336 = vmatpush.msra.mxu2 %v207_v29 }
  0x9e   :  { %337 = vmatpush.msra.mxu2 %v205_v32 }
  0xa0   :  { %338 = vmatpush.msra.mxu2 %v203_v34 }
  0xa2   :  { %339 = vmatpush.msra.mxu2 %v201_v36 }
  0xa4   :  { %340 = vmatpush.msra.mxu2 %v199_v37 }
  0xa6   :  { %341 = vmatpush.msra.mxu2 %v197_v38 }
 0x104   :  { %v118_v48 = vpop.f32.mrf.mxu1 }
 0x105   :  { %v119_v49 = vadd.f32 %v118_v48, %v91_v46 }
 0x107   :  { %v161_v50 = vmax.f32 %v119_v49, 0.0 }
 0x109   :  { %262 = vmatmul.f32.vlgmr.msra.gmra.mxu0 %v161_v50  ;;  %322 = vmatmul.f32.vlgmr.msrb.gmra.mxu3 %v161_v50 }
 0x10a   :  { %v138_v53 = vpop.f32.mrf.mxu2 }
 0x10b   :  { %v139_v54 = vadd.f32 %v138_v53, %v92_v51  ;;  %v158_v55 = vpop.f32.mrf.mxu3 }
 0x10c   :  { %v159_v56 = vadd.f32 %v158_v55, %v93_v52 }
 0x10d   :  { %v162_v57 = vmax.f32 %v139_v54, 0.0 }
 0x10e   :  { %v163_v58 = vmax.f32 %v159_v56, 0.0 }
 0x10f   :  { %282 = vmatmul.f32.vlgmr.msra.gmra.mxu1 %v162_v57 }
 0x110   :  { %455 = vmatmul.msk.f32.vlgmr.msrb.gmra.mxu2 %vm242_vm2, %v163_v58 }
 0x111   :  { %456 = vmatmul.msk.f32.vlgmr.msra.gmra.mxu3 %vm242_vm2, %v163_v58 }
 0x118   :  { %342 = vmatmul.f32.vlgmr.msra.gmra.mxu2 %v162_v57 }
 0x186   :  { %v263_v8 = vpop.f32.mrf.mxu0 }
 0x187   :  { %v264_v10 = vadd.f32 %v263_v8, %v238_v7 }
 0x18c   :  { %v283_v9 = vpop.f32.mrf.mxu1  ;;  %v323_v12 = vpop.f32.mrf.mxu3 }
 0x18d   :  { %v284_v11 = vadd.f32 %v283_v9, %v264_v10  ;;  %v324_v17 = vadd.f32 %v323_v12, %v239_v15 }
 0x193   :  { %v303_v13 = vpop.f32.mrf.mxu2 }
 0x194   :  { %v304_v14 = vadd.f32 %v303_v13, %v284_v11  ;;  %v363_v20 = vpop.f32.mrf.mxu3 }
 0x196   :  { %v366_v16 = vmax.f32 %v304_v14, 0.0 }
 0x198   :  { %409 = vmatmul.f32.vlgmr.msrb.gmra.mxu0 %v366_v16 }
 0x19b   :  { %v343_v18 = vpop.f32.mrf.mxu2 }
 0x19c   :  { %v344_v19 = vadd.f32 %v343_v18, %v324_v17 }
 0x19e   :  { %v364_v21 = vadd.f32 %v363_v20, %v344_v19 }
 0x1a0   :  { %v367_v22 = vmax.f32 %v364_v21, 0.0 }
 0x1a2   :  { %457 = vmatmul.msk.f32.vlgmr.msrb.gmra.mxu1 %vm40_vm0, %v367_v22 }
 0x215   :  { %v410_v24 = vpop.f32.mrf.mxu0 }
 0x216   :  { %v411_v25 = vadd.f32 %v460_v23, %v410_v24 }
 0x21f   :  { %v430_v26 = vpop.f32.mrf.mxu1 }
 0x220   :  { %v431_v27 = vadd.f32 %v430_v26, %v411_v25 }
 0x222   :  { %434 = vst.msk [vmem:[#allocation2] sm:$0xff] %vm433_vm3, %v431_v27 }
 0x223   :  { %445 = dma.vmem_to_hbm [thread:$0]  %s441_s26, 128, %s443_s2, [#allocation3]  }
 0x224   :  { %485 = dma.done.wait [#allocation3], 128  }
 0x225   :  { %486 = vsyncadd [#allocation3], 4294967168 }
 0x226   :  { %450 = vsyncpa [#allocation3], 1 }

</bundles_post_ra>
